<compile_context>
chip_gen: v6e
topology: v6e:2x2x1
jax: 0.10.0
libtpu: 0.0.40
codegen_flags: <defaults>
</compile_context>

<pallas_src>
import jax
import jax.numpy as jnp
from jax.experimental import pallas as pl
from jax.experimental.pallas import tpu as pltpu

NUM_REGIONS = 5
FEAT = 768                 # ViT CLS embedding dim
H1 = 96                    # linear:  768 -> 96
H1P = 128                  # H1 zero-padded to a full lane width
H2 = 14                    # linear2: 96  -> 14
H3_IN = H2 * NUM_REGIONS   # 70 (concat of 5 regions)
OUT = 14                   # linear3: 70  -> 14
BN_EPS = 1e-5


def disease_head_kernel(feat_ref,
                        w1_ref, b1_ref,
                        w2_ref, b2_ref,
                        w3_ref, b3_ref,
                        s3_ref, t3_ref,
                        out_ref):
    """Fused per-region MLP head + concat + final MLP + tanh for one batch tile."""
    R, TB, F = feat_ref.shape
    # TB is always a multiple of 16 (or the full padded batch), so merging the leading
    # dims is a layout-compatible (free) reshape.
    f = feat_ref[...].reshape(R * TB, F)                            # (5*TB, 768) bf16

    # linear(768->96, padded to 128 lanes) -> ReLU   (bn1 folded into w2/b2)
    h1 = jnp.dot(f, w1_ref[...], preferred_element_type=jnp.float32) + b1_ref[...]
    h1 = jnp.maximum(h1, 0.0).astype(jnp.bfloat16)                  # (5*TB, 128)

    # bn1-folded linear2(128->14) -> ReLU             (bn2 folded into w3/b3)
    h2 = jnp.dot(h1, w2_ref[...], preferred_element_type=jnp.float32) + b2_ref[...]
    h2 = jnp.maximum(h2, 0.0)                                       # (5*TB, 14) f32

    # concat over regions + bn2-folded linear3  ==  sum_r  h2_r @ w3_r.
    # Accumulate the 5 tiny (TB,14)x(14,14) matmuls into one f32 accumulator
    # (no (5,TB,14) temp, no separate cross-slab reduce).
    acc = jnp.dot(h2[0:TB], w3_ref[0], preferred_element_type=jnp.float32)
    for r in range(1, R):
        acc = acc + jnp.dot(h2[r * TB:(r + 1) * TB], w3_ref[r],
                            preferred_element_type=jnp.float32)
    h3 = acc + b3_ref[...]                                          # (TB, 14)

    # ReLU -> bn3 -> dropout2(identity, eval) -> tanh
    h3 = jnp.maximum(h3, 0.0) * s3_ref[...] + t3_ref[...]
    out_ref[...] = jnp.tanh(h3)


def _tile_and_vmem():
    """Generation-aware batch-tile ceiling and scoped-VMEM limit."""
    try:
        vmem = int(pltpu.get_tpu_info().vmem_capacity_bytes)
    except Exception:
        vmem = 64 * 1024 * 1024                        # conservative fallback
    if vmem >= 128 * 1024 * 1024:                      # v5e / v6e: 128 MiB physical VMEM
        return 1024, 64 * 1024 * 1024
    return 512, 32 * 1024 * 1024                       # v7x: 64 MiB VMEM per TensorCore


def disease_head(feats, params):
    """feats: (NUM_REGIONS, B, 768) bf16; params: tuple of 8 pre-folded arrays."""
    R, B, F = feats.shape
    max_tb, vmem_limit = _tile_and_vmem()

    if B < 16:
        # Tiny batch: pad to one clean 16-row tile (negligible extra traffic) so all
        # in-kernel reshapes/slices stay sublane-tile aligned.
        Bp = 16
        feats = jnp.pad(feats, ((0, 0), (0, Bp - B), (0, 0)))
        tb = 16
    else:
        # No wrapper pad: Pallas handles the ragged last block (reads of the tail are
        # garbage but every op is row-wise and the output write is clipped to B rows).
        Bp = B
        tb = min(max_tb, ((B + 1) // 2 + 15) // 16 * 16)   # >=2 steps for mid-size B
    grid = (pl.cdiv(Bp, tb),)

    n_rows = R * Bp
    flops = 2 * n_rows * (F * H1P + H1P * H2) + 2 * Bp * H3_IN * OUT
    bytes_accessed = (feats.size * feats.dtype.itemsize
                      + sum(int(p.size) * p.dtype.itemsize for p in params)
                      + Bp * OUT * 4)

    out = pl.pallas_call(
        disease_head_kernel,
        out_shape=jax.ShapeDtypeStruct((Bp, OUT), jnp.float32),
        grid_spec=pltpu.PrefetchScalarGridSpec(
            num_scalar_prefetch=0,
            grid=grid,
            in_specs=[
                pl.BlockSpec((R, tb, F), lambda i: (0, i, 0)),              # feats (batch-tiled)
                pl.BlockSpec((F, H1P), lambda i: (0, 0)),                   # w1   (resident)
                pl.BlockSpec((1, H1P), lambda i: (0, 0)),                   # b1
                pl.BlockSpec((H1P, H2), lambda i: (0, 0)),                  # w2 (bn1-folded)
                pl.BlockSpec((1, H2), lambda i: (0, 0)),                    # b2 (bn1-folded)
                pl.BlockSpec((NUM_REGIONS, H2, OUT), lambda i: (0, 0, 0)),  # w3 (bn2-folded)
                pl.BlockSpec((1, OUT), lambda i: (0, 0)),                   # b3 (bn2-folded)
                pl.BlockSpec((1, OUT), lambda i: (0, 0)),                   # s3
                pl.BlockSpec((1, OUT), lambda i: (0, 0)),                   # t3
            ],
            out_specs=pl.BlockSpec((tb, OUT), lambda i: (i, 0)),
        ),
        compiler_params=pltpu.CompilerParams(
            dimension_semantics=("parallel",),        # shard batch tiles across TCs (v7x)
            vmem_limit_bytes=vmem_limit,
        ),
        cost_estimate=pl.CostEstimate(
            flops=flops,
            transcendentals=Bp * OUT,
            bytes_accessed=bytes_accessed),
    )(feats, *params)
    return out[:B]


def init_params(key):
    """Deterministic PyTorch-style init, then eval-mode BN folding + lane padding."""
    ks = jax.random.split(key, 6)

    def lin(k, fan_in, fan_out):
        kw, kb = jax.random.split(k)
        bound = 1.0 / jnp.sqrt(jnp.float32(fan_in))
        w = jax.random.uniform(kw, (fan_out, fan_in), jnp.float32, -bound, bound)
        b = jax.random.uniform(kb, (fan_out,), jnp.float32, -bound, bound)
        return w, b

    def bn_folded(k, n):
        kg, kb, km, kv = jax.random.split(k, 4)
        gamma = 1.0 + 0.1 * jax.random.normal(kg, (n,), jnp.float32)
        beta = 0.1 * jax.random.normal(kb, (n,), jnp.float32)
        mean = 0.1 * jax.random.normal(km, (n,), jnp.float32)
        var = 0.9 + 0.1 * jnp.abs(jax.random.normal(kv, (n,), jnp.float32))
        scale = gamma / jnp.sqrt(var + BN_EPS)
        shift = beta - mean * scale
        return scale, shift

    w1, b1 = lin(ks[0], FEAT, H1)        # (96, 768), (96,)
    s1, t1 = bn_folded(ks[1], H1)
    w2, b2 = lin(ks[2], H1, H2)          # (14, 96), (14,)
    s2, t2 = bn_folded(ks[3], H2)
    w3, b3 = lin(ks[4], H3_IN, OUT)      # (14, 70), (14,)
    s3, t3 = bn_folded(ks[5], OUT)

    # Fold bn1 into linear2 and bn2 into linear3 (eval semantics; order: lin->relu->bn).
    w2t = s1[:, None] * w2.T                              # (96, 14): diag(s1) @ W2^T
    b2f = b2 + t1 @ w2.T                                  # (14,)
    w3t = jnp.tile(s2, NUM_REGIONS)[:, None] * w3.T       # (70, 14)
    b3f = b3 + jnp.tile(t2, NUM_REGIONS) @ w3.T           # (14,)

    # Zero-pad H1 (96 -> 128) so h1 vregs are lane-dense; padded lanes stay exactly 0.
    w1p = jnp.zeros((FEAT, H1P), jnp.float32).at[:, :H1].set(w1.T)
    b1p = jnp.zeros((H1P,), jnp.float32).at[:H1].set(b1)
    w2p = jnp.zeros((H1P, H2), jnp.float32).at[:H1, :].set(w2t)

    w3r = w3t.reshape(NUM_REGIONS, H2, OUT)               # (5, 14, 14), region-major rows

    # Large weights bf16 for the MXU; small final-stage weights + biases/scales stay f32.
    return (w1p.astype(jnp.bfloat16), b1p[None, :],
            w2p.astype(jnp.bfloat16), b2f[None, :],
            w3r, b3f[None, :],
            s3[None, :], t3[None, :])


def visual_extractor_stub(region):
    # TODO(synk): the frozen pretrained vision backbone (self.model + image_processor,
    # e.g. a HF ViT) is an external checkpointed model with no in-script equivalent;
    # replaced by deterministic 14x14 average-pool patch features -> 768 dims.
    b, c, h, w = region.shape                             # (B, 3, 224, 224)
    r = region.reshape(b, c, 16, 14, 16, 14)
    feat = r.mean(axis=(3, 5)).reshape(b, c * 16 * 16)    # (B, 768)
    return feat


def disease_detector_forward(x, params):
    """x: (B, 3, 224, 1120) NCHW image, split into 5 width-224 regions (as in PyTorch)."""
    regions = [x[:, :, :, i:i + 224] for i in range(0, 1120, 224)]
    feats = jnp.stack([visual_extractor_stub(r) for r in regions], axis=0)  # (5, B, 768)
    return disease_head(feats.astype(jnp.bfloat16), params)


if __name__ == "__main__":
    key = jax.random.PRNGKey(0)
    k_x, k_p = jax.random.split(key)
    x = jax.random.normal(k_x, (2, 3, 224, 1120), jnp.float32)
    params = init_params(k_p)

    out = disease_detector_forward(x, params)
    out = jax.block_until_ready(out)

    assert out.shape == (2, 14), out.shape
    assert out.dtype == jnp.float32
    assert bool(jnp.all(jnp.isfinite(out)))
    assert bool(jnp.all(jnp.abs(out) <= 1.0))  # tanh range
    print("KERNEL_OK")
</pallas_src>

<mosaic_0001>
module attributes {stable_mosaic.version = 11 : i64} {
  func.func @disease_head_kernel(%arg0: i32, %arg1: memref<5x16x768xbf16, #tpu.memory_space<vmem>>, %arg2: memref<768x128xbf16, #tpu.memory_space<vmem>>, %arg3: memref<1x128xf32, #tpu.memory_space<vmem>>, %arg4: memref<128x14xbf16, #tpu.memory_space<vmem>>, %arg5: memref<1x14xf32, #tpu.memory_space<vmem>>, %arg6: memref<5x14x14xf32, #tpu.memory_space<vmem>>, %arg7: memref<1x14xf32, #tpu.memory_space<vmem>>, %arg8: memref<1x14xf32, #tpu.memory_space<vmem>>, %arg9: memref<1x14xf32, #tpu.memory_space<vmem>>, %arg10: memref<16x14xf32, #tpu.memory_space<vmem>>) attributes {dimension_semantics = [#tpu.dimension_semantics<parallel>], iteration_bounds = array<i64: 1>, scalar_prefetch = 0 : i64, scratch_operands = 0 : i64, tpu.core_type = #tpu.core_type<tc>, window_params = [{transform_indices = @transform_0, window_bounds = array<i64: 5, 16, 768>}, {pipeline_mode = #tpu.pipeline_mode<synchronous>, transform_indices = @transform_1, window_bounds = array<i64: 768, 128>}, {pipeline_mode = #tpu.pipeline_mode<synchronous>, transform_indices = @transform_2, window_bounds = array<i64: 1, 128>}, {pipeline_mode = #tpu.pipeline_mode<synchronous>, transform_indices = @transform_3, window_bounds = array<i64: 128, 14>}, {pipeline_mode = #tpu.pipeline_mode<synchronous>, transform_indices = @transform_4, window_bounds = array<i64: 1, 14>}, {pipeline_mode = #tpu.pipeline_mode<synchronous>, transform_indices = @transform_5, window_bounds = array<i64: 5, 14, 14>}, {pipeline_mode = #tpu.pipeline_mode<synchronous>, transform_indices = @transform_6, window_bounds = array<i64: 1, 14>}, {pipeline_mode = #tpu.pipeline_mode<synchronous>, transform_indices = @transform_7, window_bounds = array<i64: 1, 14>}, {pipeline_mode = #tpu.pipeline_mode<synchronous>, transform_indices = @transform_8, window_bounds = array<i64: 1, 14>}, {transform_indices = @transform_9, window_bounds = array<i64: 16, 14>}]} {
    %c0 = arith.constant 0 : index
    %c0_0 = arith.constant 0 : index
    %c0_1 = arith.constant 0 : index
    %0 = vector.load %arg1[%c0, %c0_0, %c0_1] : memref<5x16x768xbf16, #tpu.memory_space<vmem>>, vector<5x16x768xbf16>
    %1 = vector.shape_cast %0 : vector<5x16x768xbf16> to vector<80x768xbf16>
    %c0_2 = arith.constant 0 : index
    %c0_3 = arith.constant 0 : index
    %2 = vector.load %arg2[%c0_2, %c0_3] : memref<768x128xbf16, #tpu.memory_space<vmem>>, vector<768x128xbf16>
    %cst = arith.constant dense<0.000000e+00> : vector<80x128xf32>
    %3 = tpu.matmul %1, %2, %cst {dimension_numbers = #tpu.dot_dimension_numbers<[1], [0], [0], [1], [0, 0, 1, 1], [], []>} : vector<80x768xbf16>, vector<768x128xbf16>, vector<80x128xf32> -> vector<80x128xf32>
    %c0_4 = arith.constant 0 : index
    %c0_5 = arith.constant 0 : index
    %4 = vector.load %arg3[%c0_4, %c0_5] : memref<1x128xf32, #tpu.memory_space<vmem>>, vector<1x128xf32>
    %5 = vector.broadcast %4 : vector<1x128xf32> to vector<80x128xf32>
    %6 = arith.addf %3, %5 : vector<80x128xf32>
    %cst_6 = arith.constant 0.000000e+00 : f32
    %7 = vector.broadcast %cst_6 : f32 to vector<80x128xf32>
    %8 = arith.maximumf %6, %7 : vector<80x128xf32>
    %9 = arith.truncf %8 : vector<80x128xf32> to vector<80x128xbf16>
    %c0_7 = arith.constant 0 : index
    %c0_8 = arith.constant 0 : index
    %10 = vector.load %arg4[%c0_7, %c0_8] : memref<128x14xbf16, #tpu.memory_space<vmem>>, vector<128x14xbf16>
    %cst_9 = arith.constant dense<0.000000e+00> : vector<80x14xf32>
    %11 = tpu.matmul %9, %10, %cst_9 {dimension_numbers = #tpu.dot_dimension_numbers<[1], [0], [0], [1], [0, 0, 1, 1], [], []>} : vector<80x128xbf16>, vector<128x14xbf16>, vector<80x14xf32> -> vector<80x14xf32>
    %c0_10 = arith.constant 0 : index
    %c0_11 = arith.constant 0 : index
    %12 = vector.load %arg5[%c0_10, %c0_11] : memref<1x14xf32, #tpu.memory_space<vmem>>, vector<1x14xf32>
    %13 = vector.broadcast %12 : vector<1x14xf32> to vector<80x14xf32>
    %14 = arith.addf %11, %13 : vector<80x14xf32>
    %cst_12 = arith.constant 0.000000e+00 : f32
    %15 = vector.broadcast %cst_12 : f32 to vector<80x14xf32>
    %16 = arith.maximumf %14, %15 : vector<80x14xf32>
    %17 = vector.extract_strided_slice %16 {offsets = [0, 0], sizes = [16, 14], strides = [1, 1]} : vector<80x14xf32> to vector<16x14xf32>
    %c0_13 = arith.constant 0 : index
    %c0_14 = arith.constant 0 : index
    %c0_15 = arith.constant 0 : index
    %18 = vector.load %arg6[%c0_13, %c0_14, %c0_15] : memref<5x14x14xf32, #tpu.memory_space<vmem>>, vector<1x14x14xf32>
    %19 = vector.shape_cast %18 : vector<1x14x14xf32> to vector<14x14xf32>
    %cst_16 = arith.constant dense<0.000000e+00> : vector<16x14xf32>
    %20 = tpu.matmul %17, %19, %cst_16 {dimension_numbers = #tpu.dot_dimension_numbers<[1], [0], [0], [1], [0, 0, 1, 1], [], []>} : vector<16x14xf32>, vector<14x14xf32>, vector<16x14xf32> -> vector<16x14xf32>
    %21 = vector.extract_strided_slice %16 {offsets = [16, 0], sizes = [16, 14], strides = [1, 1]} : vector<80x14xf32> to vector<16x14xf32>
    %c1 = arith.constant 1 : index
    %c0_17 = arith.constant 0 : index
    %c0_18 = arith.constant 0 : index
    %22 = vector.load %arg6[%c1, %c0_17, %c0_18] : memref<5x14x14xf32, #tpu.memory_space<vmem>>, vector<1x14x14xf32>
    %23 = vector.shape_cast %22 : vector<1x14x14xf32> to vector<14x14xf32>
    %cst_19 = arith.constant dense<0.000000e+00> : vector<16x14xf32>
    %24 = tpu.matmul %21, %23, %cst_19 {dimension_numbers = #tpu.dot_dimension_numbers<[1], [0], [0], [1], [0, 0, 1, 1], [], []>} : vector<16x14xf32>, vector<14x14xf32>, vector<16x14xf32> -> vector<16x14xf32>
    %25 = arith.addf %20, %24 : vector<16x14xf32>
    %26 = vector.extract_strided_slice %16 {offsets = [32, 0], sizes = [16, 14], strides = [1, 1]} : vector<80x14xf32> to vector<16x14xf32>
    %c2 = arith.constant 2 : index
    %c0_20 = arith.constant 0 : index
    %c0_21 = arith.constant 0 : index
    %27 = vector.load %arg6[%c2, %c0_20, %c0_21] : memref<5x14x14xf32, #tpu.memory_space<vmem>>, vector<1x14x14xf32>
    %28 = vector.shape_cast %27 : vector<1x14x14xf32> to vector<14x14xf32>
    %cst_22 = arith.constant dense<0.000000e+00> : vector<16x14xf32>
    %29 = tpu.matmul %26, %28, %cst_22 {dimension_numbers = #tpu.dot_dimension_numbers<[1], [0], [0], [1], [0, 0, 1, 1], [], []>} : vector<16x14xf32>, vector<14x14xf32>, vector<16x14xf32> -> vector<16x14xf32>
    %30 = arith.addf %25, %29 : vector<16x14xf32>
    %31 = vector.extract_strided_slice %16 {offsets = [48, 0], sizes = [16, 14], strides = [1, 1]} : vector<80x14xf32> to vector<16x14xf32>
    %c3 = arith.constant 3 : index
    %c0_23 = arith.constant 0 : index
    %c0_24 = arith.constant 0 : index
    %32 = vector.load %arg6[%c3, %c0_23, %c0_24] : memref<5x14x14xf32, #tpu.memory_space<vmem>>, vector<1x14x14xf32>
    %33 = vector.shape_cast %32 : vector<1x14x14xf32> to vector<14x14xf32>
    %cst_25 = arith.constant dense<0.000000e+00> : vector<16x14xf32>
    %34 = tpu.matmul %31, %33, %cst_25 {dimension_numbers = #tpu.dot_dimension_numbers<[1], [0], [0], [1], [0, 0, 1, 1], [], []>} : vector<16x14xf32>, vector<14x14xf32>, vector<16x14xf32> -> vector<16x14xf32>
    %35 = arith.addf %30, %34 : vector<16x14xf32>
    %36 = vector.extract_strided_slice %16 {offsets = [64, 0], sizes = [16, 14], strides = [1, 1]} : vector<80x14xf32> to vector<16x14xf32>
    %c4 = arith.constant 4 : index
    %c0_26 = arith.constant 0 : index
    %c0_27 = arith.constant 0 : index
    %37 = vector.load %arg6[%c4, %c0_26, %c0_27] : memref<5x14x14xf32, #tpu.memory_space<vmem>>, vector<1x14x14xf32>
    %38 = vector.shape_cast %37 : vector<1x14x14xf32> to vector<14x14xf32>
    %cst_28 = arith.constant dense<0.000000e+00> : vector<16x14xf32>
    %39 = tpu.matmul %36, %38, %cst_28 {dimension_numbers = #tpu.dot_dimension_numbers<[1], [0], [0], [1], [0, 0, 1, 1], [], []>} : vector<16x14xf32>, vector<14x14xf32>, vector<16x14xf32> -> vector<16x14xf32>
    %40 = arith.addf %35, %39 : vector<16x14xf32>
    %c0_29 = arith.constant 0 : index
    %c0_30 = arith.constant 0 : index
    %41 = vector.load %arg7[%c0_29, %c0_30] : memref<1x14xf32, #tpu.memory_space<vmem>>, vector<1x14xf32>
    %42 = vector.broadcast %41 : vector<1x14xf32> to vector<16x14xf32>
    %43 = arith.addf %40, %42 : vector<16x14xf32>
    %cst_31 = arith.constant 0.000000e+00 : f32
    %44 = vector.broadcast %cst_31 : f32 to vector<16x14xf32>
    %45 = arith.maximumf %43, %44 : vector<16x14xf32>
    %c0_32 = arith.constant 0 : index
    %c0_33 = arith.constant 0 : index
    %46 = vector.load %arg8[%c0_32, %c0_33] : memref<1x14xf32, #tpu.memory_space<vmem>>, vector<1x14xf32>
    %47 = vector.broadcast %46 : vector<1x14xf32> to vector<16x14xf32>
    %48 = arith.mulf %45, %47 : vector<16x14xf32>
    %c0_34 = arith.constant 0 : index
    %c0_35 = arith.constant 0 : index
    %49 = vector.load %arg9[%c0_34, %c0_35] : memref<1x14xf32, #tpu.memory_space<vmem>>, vector<1x14xf32>
    %50 = vector.broadcast %49 : vector<1x14xf32> to vector<16x14xf32>
    %51 = arith.addf %48, %50 : vector<16x14xf32>
    %52 = math.tanh %51 : vector<16x14xf32>
    %c0_36 = arith.constant 0 : index
    %c0_37 = arith.constant 0 : index
    %53 = vector.load %arg10[%c0_36, %c0_37] : memref<16x14xf32, #tpu.memory_space<vmem>>, vector<16x14xf32>
    tpu.vector_store %arg10[%c0_36, %c0_37], %52 {strides = array<i32>} : memref<16x14xf32, #tpu.memory_space<vmem>>, vector<16x14xf32>,
    return
  }
  func.func @transform_0(%arg0: i32) -> (i32, i32, i32) {
    %c0_i32 = arith.constant 0 : i32
    %c0_i32_0 = arith.constant 0 : i32
    %c0_i32_1 = arith.constant 0 : i32
    return %c0_i32, %arg0, %c0_i32_0 : i32, i32, i32
  }
  func.func @transform_1(%arg0: i32) -> (i32, i32) {
    %c0_i32 = arith.constant 0 : i32
    %c0_i32_0 = arith.constant 0 : i32
    %c0_i32_1 = arith.constant 0 : i32
    return %c0_i32, %c0_i32_0 : i32, i32
  }
  func.func @transform_2(%arg0: i32) -> (i32, i32) {
    %c0_i32 = arith.constant 0 : i32
    %c0_i32_0 = arith.constant 0 : i32
    %c0_i32_1 = arith.constant 0 : i32
    return %c0_i32, %c0_i32_0 : i32, i32
  }
  func.func @transform_3(%arg0: i32) -> (i32, i32) {
    %c0_i32 = arith.constant 0 : i32
    %c0_i32_0 = arith.constant 0 : i32
    %c0_i32_1 = arith.constant 0 : i32
    return %c0_i32, %c0_i32_0 : i32, i32
  }
  func.func @transform_4(%arg0: i32) -> (i32, i32) {
    %c0_i32 = arith.constant 0 : i32
    %c0_i32_0 = arith.constant 0 : i32
    %c0_i32_1 = arith.constant 0 : i32
    return %c0_i32, %c0_i32_0 : i32, i32
  }
  func.func @transform_5(%arg0: i32) -> (i32, i32, i32) {
    %c0_i32 = arith.constant 0 : i32
    %c0_i32_0 = arith.constant 0 : i32
    %c0_i32_1 = arith.constant 0 : i32
    %c0_i32_2 = arith.constant 0 : i32
    return %c0_i32, %c0_i32_0, %c0_i32_1 : i32, i32, i32
  }
  func.func @transform_6(%arg0: i32) -> (i32, i32) {
    %c0_i32 = arith.constant 0 : i32
    %c0_i32_0 = arith.constant 0 : i32
    %c0_i32_1 = arith.constant 0 : i32
    return %c0_i32, %c0_i32_0 : i32, i32
  }
  func.func @transform_7(%arg0: i32) -> (i32, i32) {
    %c0_i32 = arith.constant 0 : i32
    %c0_i32_0 = arith.constant 0 : i32
    %c0_i32_1 = arith.constant 0 : i32
    return %c0_i32, %c0_i32_0 : i32, i32
  }
  func.func @transform_8(%arg0: i32) -> (i32, i32) {
    %c0_i32 = arith.constant 0 : i32
    %c0_i32_0 = arith.constant 0 : i32
    %c0_i32_1 = arith.constant 0 : i32
    return %c0_i32, %c0_i32_0 : i32, i32
  }
  func.func @transform_9(%arg0: i32) -> (i32, i32) {
    %c0_i32 = arith.constant 0 : i32
    %c0_i32_0 = arith.constant 0 : i32
    return %arg0, %c0_i32 : i32, i32
  }
}

</mosaic_0001>

<bundles_post_ra>
// kernel: tpu_custom_call.1
= control target key start
LH: loop header
LB: loop body
LE: loop exit
PB: predicated region body
PF: predicated region fallthrough
CT: control target
= control target key end

     0   :  { %14 = vsyncpa [#allocation3], 0  ;;  %s2304_s0 = inlined_call_operand.hbm [shape: bf16[5,16,768], index: 0, kind: input, shape index: {}]   ;;  %s2305_s1 = inlined_call_operand.hbm [shape: bf16[768,128], index: 1, kind: input, shape index: {}]   ;;  %s2306_s2 = inlined_call_operand.vmem [shape: f32[1,128], index: 2, kind: input, shape index: {}]   ;;  %s2307_s3 = inlined_call_operand.vmem [shape: bf16[128,14], index: 3, kind: input, shape index: {}]   ;;  %s2308_s4 = inlined_call_operand.hbm [shape: f32[1,14], index: 4, kind: input, shape index: {}]   ;;  %s2309_s5 = inlined_call_operand.vmem [shape: f32[5,14,14], index: 5, kind: input, shape index: {}]   ;;  %s2310_s6 = inlined_call_operand.vmem [shape: f32[1,14], index: 6, kind: input, shape index: {}]   ;;  %s2311_s7 = inlined_call_operand.vmem [shape: f32[1,14], index: 7, kind: input, shape index: {}]   ;;  %s2312_s8 = inlined_call_operand.vmem [shape: f32[1,14], index: 8, kind: input, shape index: {}]   ;;  %s2313_s9 = inlined_call_operand.hbm [shape: f32[16,14], index: 9, kind: output, shape index: {}]  }
   0x1   :  { %15 = vsyncpa [#allocation6], 0 }
   0x2   :  { %16 = vsyncpa [#allocation4], 0  ;;  %s2084_s30 = smov [#allocation5]  }
   0x3   :  { %s34_s10 = sshll.u32 %s2084_s30, 4  ;;  %s35_s10 = int_to_ptr.vmem [resolvable:$true] %s34_s10 }
   0x4   :  { %s2006_s11 = scalar_lea.vmem %s35_s10, 6144  ;;  %p2011_p1 = scmp.lt.s32.totalorder %s35_s10, %s35_s10 }
   0x5   :  { %p2007_p0 = scmp.ne.s32.totalorder %s35_s10, %s2006_s11  ;;  %p2012_p2 = scmp.lt.s32.totalorder %s2006_s11, %s2006_s11 }
   0x7   :  { %p2013_p3 = por %p2012_p2, %p2011_p1 }
   0x9   :  { %p2014_p4 = pnand %p2013_p3, %p2007_p0 }
   0xb   :  { %2017 = shalt.err (!%p2014_p4)
}
   0xc   :  { %s2085_s12 = smov 64   ;;  %s2086_s13 = smov 4  }
   0xd   :  { %40 = dma.hbm_to_vmem [thread:$0]  %s2305_s1, 6144, %s35_s10, [#allocation6], %s2085_s12, %s2085_s12, %s2086_s13  }
   0xe   :  { %s2087_s16 = smov [#allocation2]  }
   0xf   :  { %s22_s17 = sshll.u32 %s2087_s16, 4  ;;  %s23_s17 = int_to_ptr.vmem [resolvable:$true] %s22_s17 }
  0x10   :  { %s2026_s18 = scalar_lea.vmem %s23_s17, 3840  ;;  %p2031_p6 = scmp.lt.s32.totalorder %s23_s17, %s23_s17 }
  0x11   :  { %p2027_p5 = scmp.ne.s32.totalorder %s23_s17, %s2026_s18  ;;  %p2032_p7 = scmp.lt.s32.totalorder %s2026_s18, %s2026_s18 }
  0x13   :  { %p2033_p8 = por %p2032_p7, %p2031_p6 }
  0x15   :  { %p2034_p9 = pnand %p2033_p8, %p2027_p5 }
  0x17   :  { %2037 = shalt.err (!%p2034_p9)
}
  0x18   :  { %s2088_s19 = smov 384   ;;  %s2089_s20 = smov 24  }
  0x19   :  { %28 = dma.hbm_to_vmem [thread:$0]  %s2304_s0, 3840, %s23_s17, [#allocation3], %s2088_s19, %s2088_s19, %s2089_s20  }
  0x1a   :  { %s2090_s23 = smov [#allocation7]  }
  0x1b   :  { %s51_s24 = sshll.u32 %s2090_s23, 4  ;;  %s52_s24 = int_to_ptr.vmem [resolvable:$true] %s51_s24 }
  0x1c   :  { %s2046_s1 = scalar_lea.vmem %s52_s24, 16  ;;  %s2050_s25 = scalar_lea.vmem %s52_s24, 32 }
  0x1d   :  { %p2047_p10 = scmp.ne.s32.totalorder %s52_s24, %s2046_s1  ;;  %p2051_p11 = scmp.lt.s32.totalorder %s52_s24, %s52_s24 }
  0x1e   :  { %p2052_p12 = scmp.lt.s32.totalorder %s2050_s25, %s2046_s1 }
  0x20   :  { %p2053_p13 = por %p2052_p12, %p2051_p11 }
  0x22   :  { %p2054_p0 = pnand %p2053_p13, %p2047_p10 }
  0x24   :  { %2057 = shalt.err (!%p2054_p0)
}
  0x25   :  { %54 = dma.hbm_to_vmem [thread:$0]  %s2308_s4, 16, %s52_s24, [#allocation6]  }
  0x26   :  { %2078 = dma.done.wait [#allocation3], 3840  }
  0x27   :  { %2079 = vsyncadd [#allocation3], 4294963456 }
  0x28   :  { %2080 = dma.done.wait [#allocation6], 6160  }
  0x29   :  { %2081 = vsyncadd [#allocation6], 4294961136  ;;  %v1893_v0 = vld [vmem:[#allocation5 + $0x78] sm:$0xff]   ;;  %v1897_v4 = vld [vmem:[#allocation5 + $0x70] sm:$0xff]   ;;  %vm2092_vm0 = vmmov 0   ;;  %vm1044_vm1 = vcmask 1045504  }
  0x2a   :  { %v1894_v1 = vld [vmem:[#allocation5 + $0x38] sm:$0xff]   ;;  %1639 = vmatprep.subr.bf16.mxu0 %v1893_v0  ;;  %v1898_v5 = vld [vmem:[#allocation5 + $0x30] sm:$0xff]   ;;  %v1901_v8 = vld [vmem:[#allocation5 + $0x68] sm:$0xff]   ;;  %vm1037_vm2 = vcmask 113664  }
  0x2b   :  { %v1895_v2 = vld [vmem:[#allocation5 + $0xf8] sm:$0xff]   ;;  %1640 = vmatpush3.bf16.msra.mxu0 %v1894_v1  ;;  %v1899_v6 = vld [vmem:[#allocation5 + $0xf0] sm:$0xff]   ;;  %v1902_v9 = vld [vmem:[#allocation5 + $0x28] sm:$0xff]  }
  0x2c   :  { %v1896_v3 = vld [vmem:[#allocation5 + $0xb8] sm:$0xff]   ;;  %1685 = vmatprep.subr.bf16.mxu1 %v1895_v2  ;;  %1641 = vmatprep.subr.bf16.mxu0 %v1897_v4  ;;  %v1900_v7 = vld [vmem:[#allocation5 + $0xb0] sm:$0xff]   ;;  %v1903_v10 = vld [vmem:[#allocation5 + $0xe8] sm:$0xff]  }
  0x2d   :  { %1686 = vmatpush3.bf16.msra.mxu1 %v1896_v3  ;;  %v1904_v11 = vld [vmem:[#allocation5 + $0xa8] sm:$0xff]   ;;  %v1905_v12 = vld [vmem:[#allocation5 + $0x60] sm:$0xff]   ;;  %v1909_v16 = vld [vmem:[#allocation5 + $0x58] sm:$0xff]  }
  0x2e   :  { %1687 = vmatprep.subr.bf16.mxu1 %v1899_v6  ;;  %v1906_v13 = vld [vmem:[#allocation5 + $0x20] sm:$0xff]   ;;  %v1910_v17 = vld [vmem:[#allocation5 + $0x18] sm:$0xff]   ;;  %v1913_v20 = vld [vmem:[#allocation5 + $0x50] sm:$0xff]  }
  0x2f   :  { %1642 = vmatpush3.bf16.msra.mxu0 %v1898_v5  ;;  %v1907_v14 = vld [vmem:[#allocation5 + $0xe0] sm:$0xff]   ;;  %v1911_v18 = vld [vmem:[#allocation5 + $0xd8] sm:$0xff]   ;;  %v1914_v21 = vld [vmem:[#allocation5 + $0x10] sm:$0xff]  }
  0x30   :  { %1643 = vmatprep.subr.bf16.mxu0 %v1901_v8  ;;  %v1908_v15 = vld [vmem:[#allocation5 + $0xa0] sm:$0xff]   ;;  %v1912_v19 = vld [vmem:[#allocation5 + $0x98] sm:$0xff]   ;;  %v1915_v22 = vld [vmem:[#allocation5 + $0xd0] sm:$0xff]  }
  0x31   :  { %1688 = vmatpush3.bf16.msra.mxu1 %v1900_v7  ;;  %v1916_v23 = vld [vmem:[#allocation5 + $0x90] sm:$0xff]   ;;  %v1917_v24 = vld [vmem:[#allocation5 + $0x48] sm:$0xff]   ;;  %v1921_v28 = vld [vmem:[#allocation5 + $0x40] sm:$0xff]  }
  0x32   :  { %1689 = vmatprep.subr.bf16.mxu1 %v1903_v10  ;;  %v1918_v25 = vld [vmem:[#allocation5 + $0x8] sm:$0xff]   ;;  %v1922_v29 = vld [vmem:[#allocation5] sm:$0xff]   ;;  %v1928_v34 = vld [vmem:[#allocation5 + $0x178] sm:$0xff]  }
  0x33   :  { %1644 = vmatpush3.bf16.msra.mxu0 %v1902_v9  ;;  %v1919_v26 = vld [vmem:[#allocation5 + $0xc8] sm:$0xff]   ;;  %v1923_v30 = vld [vmem:[#allocation5 + $0xc0] sm:$0xff]   ;;  %v1929_v35 = vld [vmem:[#allocation2 + $0x8] ss:$24 sps:$4 sm:$0xff]  }
  0x34   :  { %1645 = vmatprep.subr.bf16.mxu0 %v1905_v12  ;;  %v1920_v27 = vld [vmem:[#allocation5 + $0x88] sm:$0xff]   ;;  %v1927_v33 = vld [vmem:[#allocation5 + $0x80] sm:$0xff]   ;;  %v1931_v36 = vld [vmem:[#allocation2 + $0xc] ss:$24 sps:$4 sm:$0xff]  }
  0x35   :  { %1690 = vmatpush3.bf16.msra.mxu1 %v1904_v11  ;;  %v1924_v31 = vld [vmem:[#allocation2] ss:$24 sps:$4 sm:$0xff]   ;;  %v1926_v32 = vld [vmem:[#allocation2 + $0x4] ss:$24 sps:$4 sm:$0xff]   ;;  %v1932_v37 = vld [vmem:[#allocation5 + $0x138] sm:$0xff]   ;;  %749 = vmatprep.mubr.bf16.mxu1 %v1931_v36 }
  0x36   :  { %1691 = vmatprep.subr.bf16.mxu1 %v1907_v14  ;;  %676 = vmatprep.mubr.bf16.mxu0 %v1926_v32  ;;  %v1933_v38 = vld [vmem:[#allocation5 + $0x170] sm:$0xff]   ;;  %v1935_v40 = vld [vmem:[#allocation2 + $0x34] ss:$24 sps:$4 sm:$0xff]   ;;  %v1937_v41 = vld [vmem:[#allocation2 + $0x30] ss:$24 sps:$4 sm:$0xff]   ;;  %v2091_v14 = vmov 0.0  }
  0x37   :  { %1646 = vmatpush3.bf16.msra.mxu0 %v1906_v13  ;;  %v1934_v39 = vld [vmem:[#allocation5 + $0x130] sm:$0xff]   ;;  %v1938_v42 = vld [vmem:[#allocation2 + $0x3c] ss:$24 sps:$4 sm:$0xff]   ;;  %v1940_v43 = vld [vmem:[#allocation2 + $0x38] ss:$24 sps:$4 sm:$0xff]  }
  0x38   :  { %1647 = vmatprep.subr.bf16.mxu0 %v1909_v16  ;;  %v1941_v44 = vld [vmem:[#allocation5 + $0x168] sm:$0xff]   ;;  %v1945_v47 = vld [vmem:[#allocation5 + $0x160] sm:$0xff]   ;;  %v1948_v50 = vld [vmem:[#allocation2 + $0x6c] ss:$24 sps:$4 sm:$0xff]  }
  0x39   :  { %1692 = vmatpush3.bf16.msra.mxu1 %v1908_v15  ;;  %v1942_v45 = vld [vmem:[#allocation5 + $0x128] sm:$0xff]   ;;  %v1947_v48 = vld [vmem:[#allocation5 + $0x120] sm:$0xff]   ;;  %v1950_v51 = vld [vmem:[#allocation2 + $0x68] ss:$24 sps:$4 sm:$0xff]  }
  0x3a   :  { %1693 = vmatprep.subr.bf16.mxu1 %v1911_v18  ;;  %v1943_v46 = vld [vmem:[#allocation2 + $0x64] ss:$24 sps:$4 sm:$0xff]   ;;  %v1946_v49 = vld [vmem:[#allocation2 + $0x60] ss:$24 sps:$4 sm:$0xff]   ;;  %v1951_v52 = vld [vmem:[#allocation5 + $0x158] sm:$0xff]  }
  0x3b   :  { %1648 = vmatpush3.bf16.msra.mxu0 %v1910_v17  ;;  %v1952_v53 = vld [vmem:[#allocation5 + $0x118] sm:$0xff]   ;;  %v1956_v55 = vld [vmem:[#allocation2 + $0x9c] ss:$24 sps:$4 sm:$0xff]   ;;  %v1958_v57 = vld [vmem:[#allocation5 + $0x150] sm:$0xff]  }
  0x3c   :  { %1649 = vmatprep.subr.bf16.mxu0 %v1913_v20  ;;  %v1953_v54 = vld [vmem:[#allocation2 + $0x94] ss:$24 sps:$4 sm:$0xff]   ;;  %v1955_v56 = vld [vmem:[#allocation2 + $0x90] ss:$24 sps:$4 sm:$0xff]   ;;  %v1960_v58 = vld [vmem:[#allocation5 + $0x110] sm:$0xff]  }
  0x3d   :  { %1694 = vmatpush3.bf16.msra.mxu1 %v1912_v19  ;;  %v1961_v59 = vld [vmem:[#allocation5 + $0x148] sm:$0xff]   ;;  %v1966_v63 = vld [vmem:[#allocation2 + $0xcc] ss:$24 sps:$4 sm:$0xff]   ;;  %v1969_v0 = vld [vmem:[#allocation5 + $0x140] sm:$0xff]  }
  0x3e   :  { %1695 = vmatprep.subr.bf16.mxu1 %v1915_v22  ;;  %v1962_v60 = vld [vmem:[#allocation2 + $0xc4] ss:$24 sps:$4 sm:$0xff]   ;;  %v1959_v61 = vld [vmem:[#allocation2 + $0x98] ss:$24 sps:$4 sm:$0xff]   ;;  %v1973_v3 = vld [vmem:[#allocation2 + $0x14] ss:$24 sps:$4 sm:$0xff]  }
  0x3f   :  { %1650 = vmatpush3.bf16.msra.mxu0 %v1914_v21  ;;  %v1964_v62 = vld [vmem:[#allocation5 + $0x108] sm:$0xff]   ;;  %v1970_v1 = vld [vmem:[#allocation5 + $0x100] sm:$0xff]   ;;  %v1968_v4 = vld [vmem:[#allocation2 + $0xc8] ss:$24 sps:$4 sm:$0xff]  }
  0x40   :  { %1651 = vmatprep.subr.bf16.mxu0 %v1917_v24  ;;  %v1965_v2 = vld [vmem:[#allocation2 + $0xc0] ss:$24 sps:$4 sm:$0xff]   ;;  %v1971_v5 = vld [vmem:[#allocation2 + $0x10] ss:$24 sps:$4 sm:$0xff]   ;;  %v1974_v6 = vld [vmem:[#allocation2 + $0x44] ss:$24 sps:$4 sm:$0xff]  }
  0x41   :  { %1696 = vmatpush3.bf16.msra.mxu1 %v1916_v23  ;;  %v1976_v7 = vld [vmem:[#allocation2 + $0x40] ss:$24 sps:$4 sm:$0xff]   ;;  %v1977_v8 = vld [vmem:[#allocation2 + $0x74] ss:$24 sps:$4 sm:$0xff]   ;;  %v1979_v9 = vld [vmem:[#allocation2 + $0x70] ss:$24 sps:$4 sm:$0xff]  }
  0x42   :  { %1697 = vmatprep.subr.bf16.mxu1 %v1919_v26  ;;  %v1980_v10 = vld [vmem:[#allocation2 + $0xa4] ss:$24 sps:$4 sm:$0xff]   ;;  %v1982_v11 = vld [vmem:[#allocation2 + $0xa0] ss:$24 sps:$4 sm:$0xff]   ;;  %v1983_v12 = vld [vmem:[#allocation2 + $0xd4] ss:$24 sps:$4 sm:$0xff]  }
  0x43   :  { %1652 = vmatpush3.bf16.msra.mxu0 %v1918_v25  ;;  %v1985_v13 = vld [vmem:[#allocation2 + $0xd0] ss:$24 sps:$4 sm:$0xff]   ;;  %v1986_v15 = vld [vmem:[%s2307_s3 + $0x38] sm:$0xff]   ;;  %v1989_v18 = vld [vmem:[%s2307_s3 + $0x20] sm:$0xff]  }
  0x44   :  { %1653 = vmatprep.subr.bf16.mxu0 %v1921_v28  ;;  %v1987_v16 = vld [vmem:[%s2307_s3 + $0x30] sm:$0xff]   ;;  %v1988_v17 = vld [vmem:[%s2307_s3 + $0x28] sm:$0xff]   ;;  %v1990_v19 = vld [vmem:[%s2307_s3 + $0x18] sm:$0xff]  }
  0x45   :  { %1698 = vmatpush3.bf16.msra.mxu1 %v1920_v27  ;;  %v1991_v20 = vld [vmem:[%s2307_s3 + $0x10] sm:$0xff]   ;;  %v1992_v21 = vld [vmem:[%s2307_s3 + $0x8] sm:$0xff]   ;;  %v1993_v22 = vld [vmem:[%s2307_s3] sm:$0xff]  }
  0x46   :  { %1699 = vmatprep.subr.bf16.mxu1 %v1923_v30  ;;  %v1614_v23 = vld [vmem:[%s2309_s5 + $0x18] sm:$0x3f]  ;;  %v2195_v24 = vld [vmem:[%s2309_s5 + $0x8] sm:$0x3f] }
  0x47   :  { %1654 = vmatpush3.bf16.msra.mxu0 %v1922_v29 }
  0x48   :  { %1731 = vmatprep.subr.bf16.mxu0 %v1928_v34 }
  0x49   :  { %1700 = vmatpush3.bf16.msra.mxu1 %v1927_v33 }
  0x4a   :  { %677 = vmatmul.mubr.bf16.vlgmr.msra.gmra.mxu0 %v1924_v31  ;;  %1810 = vmatprep.subr.bf16.mxu1 %v2091_v14 }
  0x4b   :  { %1732 = vmatpush3.bf16.msra.mxu0 %v1932_v37  ;;  %684 = vmatprep.mubr.bf16.mxu0 %v1935_v40 }
  0x4c   :  { %750 = vmatmul.mubr.bf16.vlgmr.msra.gmra.mxu1 %v1929_v35  ;;  %1733 = vmatprep.subr.bf16.mxu0 %v1933_v38 }
  0x4d   :  { %757 = vmatprep.mubr.bf16.mxu1 %v1938_v42  ;;  %1811 = vmatpush3.bf16.msra.mxu1 %v1986_v15 }
  0x4e   :  { %1812 = vmatprep.subr.bf16.mxu1 %v2091_v14 }
  0x4f   :  { %1734 = vmatpush3.bf16.msra.mxu0 %v1934_v39 }
  0x50   :  { %1735 = vmatprep.subr.bf16.mxu0 %v1941_v44 }
  0x51   :  { %1813 = vmatpush3.bf16.msra.mxu1 %v1987_v16 }
  0x52   :  { %685 = vmatmul.mubr.bf16.gmra.mxu0 %v1937_v41  ;;  %1814 = vmatprep.subr.bf16.mxu1 %v2091_v14 }
  0x53   :  { %1736 = vmatpush3.bf16.msra.mxu0 %v1942_v45  ;;  %692 = vmatprep.mubr.bf16.mxu0 %v1943_v46 }
  0x54   :  { %758 = vmatmul.mubr.bf16.gmra.mxu1 %v1940_v43  ;;  %1737 = vmatprep.subr.bf16.mxu0 %v1945_v47 }
  0x55   :  { %765 = vmatprep.mubr.bf16.mxu1 %v1948_v50  ;;  %1815 = vmatpush3.bf16.msra.mxu1 %v1988_v17 }
  0x56   :  { %1816 = vmatprep.subr.bf16.mxu1 %v2091_v14 }
  0x57   :  { %1738 = vmatpush3.bf16.msra.mxu0 %v1947_v48 }
  0x58   :  { %1739 = vmatprep.subr.bf16.mxu0 %v1951_v52 }
  0x59   :  { %1817 = vmatpush3.bf16.msra.mxu1 %v1989_v18 }
  0x5a   :  { %693 = vmatmul.mubr.bf16.gmra.mxu0 %v1946_v49  ;;  %1818 = vmatprep.subr.bf16.mxu1 %v2091_v14 }
  0x5b   :  { %700 = vmatprep.mubr.bf16.mxu0 %v1953_v54  ;;  %1740 = vmatpush3.bf16.msra.mxu0 %v1952_v53 }
  0x5c   :  { %766 = vmatmul.mubr.bf16.gmra.mxu1 %v1950_v51  ;;  %1741 = vmatprep.subr.bf16.mxu0 %v1958_v57 }
  0x5d   :  { %773 = vmatprep.mubr.bf16.mxu1 %v1956_v55  ;;  %1819 = vmatpush3.bf16.msra.mxu1 %v1990_v19 }
  0x5e   :  { %1820 = vmatprep.subr.bf16.mxu1 %v2091_v14 }
  0x5f   :  { %1742 = vmatpush3.bf16.msra.mxu0 %v1960_v58 }
  0x60   :  { %1743 = vmatprep.subr.bf16.mxu0 %v1961_v59 }
  0x61   :  { %1821 = vmatpush3.bf16.msra.mxu1 %v1991_v20 }
  0x62   :  { %701 = vmatmul.mubr.bf16.gmra.mxu0 %v1955_v56  ;;  %1822 = vmatprep.subr.bf16.mxu1 %v2091_v14  ;;  %v2218_v56 = vld [vmem:[%s2306_s2] ss:$0 sm:$0xff] }
  0x63   :  { %708 = vmatprep.mubr.bf16.mxu0 %v1962_v60  ;;  %1744 = vmatpush3.bf16.msra.mxu0 %v1964_v62 }
  0x64   :  { %774 = vmatmul.mubr.bf16.gmra.mxu1 %v1959_v61  ;;  %1745 = vmatprep.subr.bf16.mxu0 %v1969_v0 }
  0x65   :  { %781 = vmatprep.mubr.bf16.mxu1 %v1966_v63  ;;  %1823 = vmatpush3.bf16.msra.mxu1 %v1992_v21 }
  0x66   :  { %1824 = vmatprep.subr.bf16.mxu1 %v2091_v14 }
  0x67   :  { %1746 = vmatpush3.bf16.msra.mxu0 %v1970_v1 }
  0x68   :  { %1846 = vmatprep.subr.msk.mxu0 %vm1044_vm1, %v1614_v23 }
  0x69   :  { %1825 = vmatpush3.bf16.msra.mxu1 %v1993_v22 }
  0x6a   :  { %709 = vmatmul.mubr.bf16.gmra.mxu0 %v1965_v2  ;;  %1853 = vmatprep.subr.msk.mxu1 %vm1044_vm1, %v2195_v24 }
  0x6b   :  { %822 = vmatprep.mubr.bf16.mxu0 %v1973_v3 }
  0x6c   :  { %782 = vmatmul.mubr.bf16.gmra.mxu1 %v1968_v4 }
  0x6d   :  { %1826 = vmatprep.mubr.msk.bf16.mxu1 %vm2092_vm0, %v2091_v14 }
  0x72   :  { %823 = vmatmul.mubr.bf16.vlgmr.msra.gmra.mxu0 %v1971_v5 }
  0x73   :  { %830 = vmatprep.mubr.bf16.mxu0 %v1974_v6  ;;  %1847 = vmatpush3.msk.msra.mxu0 %vm1044_vm1, %v1614_v23 }
  0x7a   :  { %831 = vmatmul.mubr.bf16.gmra.mxu0 %v1976_v7 }
  0x7b   :  { %838 = vmatprep.mubr.bf16.mxu0 %v1977_v8 }
  0x82   :  { %839 = vmatmul.mubr.bf16.gmra.mxu0 %v1979_v9 }
  0x83   :  { %846 = vmatprep.mubr.bf16.mxu0 %v1980_v10 }
  0x8a   :  { %847 = vmatmul.mubr.bf16.gmra.mxu0 %v1982_v11 }
  0x8b   :  { %854 = vmatprep.mubr.bf16.mxu0 %v1983_v12 }
  0x92   :  { %855 = vmatmul.mubr.bf16.gmra.mxu0 %v1985_v13 }
 0x10a   :  { %v1655_v25 = vpop.f32.mrf.mxu0 }
 0x10c   :  { %v1656_v26 = vpop.f32.mrf.mxu0  ;;  %v1701_v27 = vpop.f32.mrf.mxu1 }
 0x10d   :  { %v1657_v55 = vadd.f32 %v1656_v26, %v1655_v25 }
 0x10e   :  { %v1658_v28 = vpop.f32.mrf.mxu0  ;;  %v1702_v29 = vpop.f32.mrf.mxu1 }
 0x10f   :  { %v679_v61 = vadd.f32 %v1657_v55, %v2218_v56  ;;  %v1703_v62 = vadd.f32 %v1702_v29, %v1701_v27 }
 0x110   :  { %v1659_v30 = vpop.f32.mrf.mxu0  ;;  %v1704_v31 = vpop.f32.mrf.mxu1 }
 0x111   :  { %v1660_v58 = vadd.f32 %v1659_v30, %v1658_v28  ;;  %v752_v5 = vadd.f32 %v1703_v62, %v679_v61 }
 0x112   :  { %v1661_v32 = vpop.f32.mrf.mxu0  ;;  %v1705_v33 = vpop.f32.mrf.mxu1 }
 0x113   :  { %v682_v0 = vadd.f32 %v1660_v58, %v2218_v56  ;;  %v1706_v1 = vadd.f32 %v1705_v33, %v1704_v31 }
 0x114   :  { %v1662_v34 = vpop.f32.mrf.mxu0  ;;  %v1707_v35 = vpop.f32.mrf.mxu1 }
 0x115   :  { %v1663_v6 = vadd.f32 %v1662_v34, %v1661_v32  ;;  %v755_v9 = vadd.f32 %v1706_v1, %v682_v0 }
 0x116   :  { %v1664_v36 = vpop.f32.mrf.mxu0  ;;  %v1708_v38 = vpop.f32.mrf.mxu1 }
 0x117   :  { %v687_v15 = vadd.f32 %v1663_v6, %v2218_v56  ;;  %v1709_v16 = vadd.f32 %v1708_v38, %v1707_v35 }
 0x118   :  { %v1665_v37 = vpop.f32.mrf.mxu0  ;;  %v1710_v41 = vpop.f32.mrf.mxu1 }
 0x119   :  { %v1666_v7 = vadd.f32 %v1665_v37, %v1664_v36  ;;  %v760_v27 = vadd.f32 %v1709_v16, %v687_v15 }
 0x11a   :  { %v1667_v39 = vpop.f32.mrf.mxu0  ;;  %v1711_v44 = vpop.f32.mrf.mxu1 }
 0x11b   :  { %v690_v18 = vadd.f32 %v1666_v7, %v2218_v56  ;;  %v1712_v20 = vadd.f32 %v1711_v44, %v1710_v41 }
 0x11c   :  { %v1668_v40 = vpop.f32.mrf.mxu0  ;;  %v1713_v47 = vpop.f32.mrf.mxu1 }
 0x11d   :  { %v1669_v28 = vadd.f32 %v1668_v40, %v1667_v39  ;;  %v763_v32 = vadd.f32 %v1712_v20, %v690_v18 }
 0x11e   :  { %v1670_v42 = vpop.f32.mrf.mxu0  ;;  %v1714_v50 = vpop.f32.mrf.mxu1 }
 0x11f   :  { %v695_v37 = vadd.f32 %v1669_v28, %v2218_v56  ;;  %v1715_v38 = vadd.f32 %v1714_v50, %v1713_v47 }
 0x120   :  { %v1671_v43 = vpop.f32.mrf.mxu0  ;;  %v1716_v53 = vpop.f32.mrf.mxu1 }
 0x121   :  { %v1672_v30 = vadd.f32 %v1671_v43, %v1670_v42  ;;  %v768_v61 = vadd.f32 %v1715_v38, %v695_v37  ;;  %v1613_v37 = vld [vmem:[%s2309_s5 + $0x10] sm:$0xff]  ;;  %v1627_v38 = vld [vmem:[%s2309_s5 + $0x38] sm:$0x3f] }
 0x122   :  { %v2201_v45 = vpop.f32.mrf.mxu0  ;;  %v1717_v59 = vpop.f32.mrf.mxu1  ;;  %1848 = vmatprep.subr.mxu0 %v1613_v37 }
 0x123   :  { %v698_v39 = vadd.f32 %v1672_v30, %v2218_v56  ;;  %v1718_v42 = vadd.f32 %v1717_v59, %v1716_v53  ;;  %1849 = vmatpush3.msra.mxu0 %v1613_v37 }
 0x124   :  { %v2203_v46 = vpop.f32.mrf.mxu0  ;;  %v1719_v3 = vpop.f32.mrf.mxu1 }
 0x125   :  { %v1675_v62 = vadd.f32 %v2203_v46, %v2201_v45  ;;  %v771_v47 = vadd.f32 %v1718_v42, %v698_v39 }
 0x126   :  { %v2205_v48 = vpop.f32.mrf.mxu0  ;;  %v1720_v12 = vpop.f32.mrf.mxu1 }
 0x127   :  { %v703_v59 = vadd.f32 %v1675_v62, %v2218_v56  ;;  %v1626_v62 = vld [vmem:[%s2309_s5 + $0x30] sm:$0xff] }
 0x128   :  { %v2207_v49 = vpop.f32.mrf.mxu0  ;;  %v1722_v25 = vpop.f32.mrf.mxu1 }
 0x12a   :  { %v2209_v51 = vpop.f32.mrf.mxu0  ;;  %v1723_v35 = vpop.f32.mrf.mxu1 }
 0x12b   :  { %v1724_v6 = vadd.f32 %v1723_v35, %v1722_v25 }
 0x12c   :  { %v2211_v52 = vpop.f32.mrf.mxu0  ;;  %v1725_v58 = vpop.f32.mrf.mxu1 }
 0x12e   :  { %v2213_v54 = vpop.f32.mrf.mxu0 }
 0x130   :  { %v2220_v57 = vpop.f32.mrf.mxu0 }
 0x131   :  { %v1684_v15 = vadd.f32 %v2220_v57, %v2213_v54 }
 0x132   :  { %v1747_v60 = vpop.f32.mrf.mxu0 }
 0x134   :  { %v1748_v63 = vpop.f32.mrf.mxu0 }
 0x135   :  { %v1749_v2 = vadd.f32 %v1748_v63, %v1747_v60 }
 0x136   :  { %v1750_v4 = vpop.f32.mrf.mxu0 }
 0x137   :  { %v825_v10 = vadd.f32 %v1749_v2, %v752_v5  ;;  %v1726_v2 = vpop.f32.mrf.mxu1 }
 0x138   :  { %v1751_v8 = vpop.f32.mrf.mxu0 }
 0x139   :  { %v1752_v11 = vadd.f32 %v1751_v8, %v1750_v4  ;;  %v863_v21 = vmax.f32 %v825_v10, 0.0  ;;  %v1721_v4 = vadd.f32 %v1720_v12, %v1719_v3  ;;  %v1728_v8 = vpop.f32.mrf.mxu1 }
 0x13a   :  { %v1753_v13 = vpop.f32.mrf.mxu0 }
 0x13b   :  { %v828_v17 = vadd.f32 %v1752_v11, %v755_v9  ;;  %v776_v10 = vadd.f32 %v1721_v4, %v703_v59  ;;  %v1681_v11 = vadd.f32 %v2211_v52, %v2209_v51  ;;  %v1729_v18 = vpop.f32.mrf.mxu1  ;;  %v714_v51 = vadd.f32 %v1684_v15, %v2218_v56  ;;  %v1621_v59 = vld [vmem:[%s2309_s5 + $0x20] sm:$0xff] }
 0x13c   :  { %v1754_v19 = vpop.f32.mrf.mxu0 }
 0x13d   :  { %v864_v22 = vmax.f32 %v828_v17, 0.0  ;;  %v1755_v23 = vadd.f32 %v1754_v19, %v1753_v13  ;;  %v711_v20 = vadd.f32 %v1681_v11, %v2218_v56 }
 0x13e   :  { %v1756_v26 = vpop.f32.mrf.mxu0 }
 0x13f   :  { %v873_v29 = vpack.c.bf16 %v864_v22, %v863_v21  ;;  %v833_v33 = vadd.f32 %v1755_v23, %v760_v27  ;;  %v1727_v21 = vadd.f32 %v1726_v2, %v1725_v58  ;;  %v1730_v23 = vadd.f32 %v1729_v18, %v1728_v8 }
 0x140   :  { %v1757_v31 = vpop.f32.mrf.mxu0 }
 0x141   :  { %v1758_v34 = vadd.f32 %v1757_v31, %v1756_v26  ;;  %1827 = vmatmul.mubr.bf16.vlgmr.msra.gmra.mxu1 %v873_v29  ;;  %v865_v43 = vmax.f32 %v833_v33, 0.0  ;;  %v784_v27 = vadd.f32 %v1727_v21, %v711_v20  ;;  %v787_v30 = vadd.f32 %v1730_v23, %v714_v51 }
 0x142   :  { %v1759_v36 = vpop.f32.mrf.mxu0  ;;  %1830 = vmatprep.mubr.msk.bf16.mxu1 %vm2092_vm0, %v2091_v14  ;;  %1854 = vmatpush3.msk.msra.mxu1 %vm1044_vm1, %v2195_v24  ;;  %v1678_v24 = vadd.f32 %v2207_v49, %v2205_v48 }
 0x143   :  { %v836_v41 = vadd.f32 %v1758_v34, %v763_v32 }
 0x144   :  { %v1760_v40 = vpop.f32.mrf.mxu0  ;;  %v706_v45 = vadd.f32 %v1678_v24, %v2218_v56 }
 0x145   :  { %v866_v44 = vmax.f32 %v836_v41, 0.0  ;;  %v1761_v55 = vadd.f32 %v1760_v40, %v1759_v36  ;;  %v1032_v36 = vld [vmem:[%s2309_s5] sm:$0xff]  ;;  %v1604_v41 = vld [vmem:[#allocation7] ss:$0 sm:$0xff] }
 0x146   :  { %v1762_v60 = vpop.f32.mrf.mxu0  ;;  %v779_v3 = vadd.f32 %v1724_v6, %v706_v45  ;;  %1855 = vmatprep.subr.mxu1 %v1032_v36  ;;  %v1632_v45 = vld [vmem:[%s2309_s5 + $0x48] sm:$0x3f] }
 0x147   :  { %v874_v63 = vpack.c.bf16 %v866_v44, %v865_v43  ;;  %v841_v50 = vadd.f32 %v1761_v55, %v768_v61  ;;  %1856 = vmatpush3.msra.mxu1 %v1032_v36 }
 0x148   :  { %v1763_v0 = vpop.f32.mrf.mxu0  ;;  %1867 = vmatprep.subr.msk.mxu1 %vm1044_vm1, %v1627_v38 }
 0x149   :  { %v1764_v1 = vadd.f32 %v1763_v0, %v1762_v60  ;;  %1831 = vmatmul.mubr.bf16.gmra.mxu1 %v874_v63  ;;  %v867_v7 = vmax.f32 %v841_v50, 0.0 }
 0x14a   :  { %v1765_v53 = vpop.f32.mrf.mxu0  ;;  %1834 = vmatprep.mubr.msk.bf16.mxu1 %vm2092_vm0, %v2091_v14 }
 0x14b   :  { %v844_v5 = vadd.f32 %v1764_v1, %v771_v47 }
 0x14c   :  { %v1766_v46 = vpop.f32.mrf.mxu0 }
 0x14d   :  { %v868_v48 = vmax.f32 %v844_v5, 0.0  ;;  %v1767_v49 = vadd.f32 %v1766_v46, %v1765_v53 }
 0x14e   :  { %v1768_v9 = vpop.f32.mrf.mxu0 }
 0x14f   :  { %v875_v13 = vpack.c.bf16 %v868_v48, %v867_v7  ;;  %v849_v12 = vadd.f32 %v1767_v49, %v776_v10 }
 0x150   :  { %v1769_v16 = vpop.f32.mrf.mxu0 }
 0x151   :  { %v1770_v17 = vadd.f32 %v1769_v16, %v1768_v9  ;;  %1835 = vmatmul.mubr.bf16.gmra.mxu1 %v875_v13  ;;  %v869_v25 = vmax.f32 %v849_v12, 0.0  ;;  %v1631_v9 = vld [vmem:[%s2309_s5 + $0x40] sm:$0xff] }
 0x152   :  { %v1771_v19 = vpop.f32.mrf.mxu0  ;;  %1838 = vmatprep.mubr.msk.bf16.mxu1 %vm2092_vm0, %v2091_v14 }
 0x153   :  { %v852_v22 = vadd.f32 %v1770_v17, %v779_v3 }
 0x154   :  { %v1772_v52 = vpop.f32.mrf.mxu0 }
 0x155   :  { %v870_v54 = vmax.f32 %v852_v22, 0.0  ;;  %v1773_v57 = vadd.f32 %v1772_v52, %v1771_v19 }
 0x156   :  { %v1774_v26 = vpop.f32.mrf.mxu0 }
 0x157   :  { %v876_v28 = vpack.c.bf16 %v870_v54, %v869_v25  ;;  %v857_v31 = vadd.f32 %v1773_v57, %v784_v27 }
 0x158   :  { %v1775_v29 = vpop.f32.mrf.mxu0 }
 0x159   :  { %v1776_v32 = vadd.f32 %v1775_v29, %v1774_v26  ;;  %1839 = vmatmul.mubr.bf16.gmra.mxu1 %v876_v28  ;;  %v871_v34 = vmax.f32 %v857_v31, 0.0 }
 0x15a   :  { %1842 = vmatprep.mubr.msk.bf16.mxu1 %vm2092_vm0, %v2091_v14  ;;  %v1622_v14 = vld [vmem:[%s2309_s5 + $0x28] sm:$0x3f] }
 0x15b   :  { %v860_v33 = vadd.f32 %v1776_v32, %v787_v30  ;;  %1860 = vmatprep.subr.msk.mxu0 %vm1044_vm1, %v1622_v14 }
 0x15d   :  { %v872_v35 = vmax.f32 %v860_v33, 0.0 }
 0x15f   :  { %v877_v56 = vpack.c.bf16 %v872_v35, %v871_v34 }
 0x161   :  { %1843 = vmatmul.mubr.bf16.gmra.mxu1 %v877_v56  ;;  %v1636_v56 = vld [vmem:[%s2310_s6] ss:$0 sm:$0xff]  ;;  %s2093_s6 = smov [#allocation8]  }
 0x162   :  { %s1512_s22 = sshll.u32 %s2093_s6, 4  ;;  %s1513_s22 = int_to_ptr.vmem [resolvable:$true] %s1512_s22 }
 0x163   :  { %p2063_p2 = scmp.lt.s32.totalorder %s1513_s22, %s1513_s22 }
 0x201   :  { %v983_v39 = vpop.f32.mrf.mxu1 }
 0x202   :  { %v984_v40 = vadd.f32 %v1604_v41, %v983_v39  ;;  %v1637_v39 = vld [vmem:[%s2311_s7] ss:$0 sm:$0xff]  ;;  %s2058_s7 = scalar_lea.vmem %s1513_s22, 256 }
 0x203   :  { %v1828_v42 = vpop.f32.mrf.mxu1  ;;  %p2059_p1 = scmp.ne.s32.totalorder %s1513_s22, %s2058_s7  ;;  %p2064_p3 = scmp.lt.s32.totalorder %s2058_s7, %s2058_s7 }
 0x204   :  { %v1022_v43 = vmax.f32 %v984_v40, 0.0 }
 0x205   :  { %v986_v44 = vpop.f32.mrf.mxu1  ;;  %p2065_p4 = por %p2064_p3, %p2063_p2 }
 0x206   :  { %v987_v55 = vadd.f32 %v1604_v41, %v986_v44  ;;  %1857 = vmatprep.mubr.msk.f32.mxu1 %vm1037_vm2, %v1022_v43  ;;  %v1638_v43 = vld [vmem:[%s2312_s8] ss:$0 sm:$0xff] }
 0x207   :  { %v1829_v58 = vpop.f32.mrf.mxu1  ;;  %p2066_p5 = pnand %p2065_p4, %p2059_p1 }
 0x208   :  { %v1023_v60 = vmax.f32 %v987_v55, 0.0 }
 0x209   :  { %v991_v61 = vpop.f32.mrf.mxu1 }
 0x20a   :  { %v992_v63 = vadd.f32 %v1604_v41, %v991_v61  ;;  %1858 = vmatmul.mubr.msk.f32.vlgmr.msra.gmra.mxu1 %vm1037_vm2, %v1023_v60 }
 0x20b   :  { %v1832_v24 = vpop.f32.mrf.mxu1  ;;  %1868 = vmatpush3.msk.msra.mxu1 %vm1044_vm1, %v1627_v38 }
 0x20c   :  { %v1024_v0 = vmax.f32 %v992_v63, 0.0  ;;  %1869 = vmatprep.subr.mxu1 %v1626_v62 }
 0x20d   :  { %v994_v47 = vpop.f32.mrf.mxu1  ;;  %1870 = vmatpush3.msra.mxu1 %v1626_v62 }
 0x20e   :  { %v995_v50 = vadd.f32 %v1604_v41, %v994_v47  ;;  %1850 = vmatprep.mubr.msk.f32.mxu0 %vm1037_vm2, %v1024_v0 }
 0x20f   :  { %v1833_v1 = vpop.f32.mrf.mxu1 }
 0x210   :  { %v1025_v2 = vmax.f32 %v995_v50, 0.0 }
 0x211   :  { %v999_v53 = vpop.f32.mrf.mxu1 }
 0x212   :  { %v1000_v4 = vadd.f32 %v1604_v41, %v999_v53  ;;  %1851 = vmatmul.mubr.msk.f32.vlgmr.msra.gmra.mxu0 %vm1037_vm2, %v1025_v2 }
 0x213   :  { %v1836_v5 = vpop.f32.mrf.mxu1  ;;  %1861 = vmatpush3.msk.msra.mxu0 %vm1044_vm1, %v1622_v14 }
 0x214   :  { %v1026_v46 = vmax.f32 %v1000_v4, 0.0  ;;  %1862 = vmatprep.subr.mxu0 %v1621_v59 }
 0x215   :  { %v1002_v6 = vpop.f32.mrf.mxu1  ;;  %1863 = vmatpush3.msra.mxu0 %v1621_v59 }
 0x216   :  { %v1003_v7 = vadd.f32 %v1604_v41, %v1002_v6  ;;  %1864 = vmatprep.mubr.msk.f32.mxu0 %vm1037_vm2, %v1026_v46  ;;  %1874 = vmatprep.subr.msk.mxu0 %vm1044_vm1, %v1632_v45 }
 0x217   :  { %v1837_v48 = vpop.f32.mrf.mxu1 }
 0x218   :  { %v1027_v49 = vmax.f32 %v1003_v7, 0.0 }
 0x219   :  { %v1007_v8 = vpop.f32.mrf.mxu1 }
 0x21a   :  { %v1008_v10 = vadd.f32 %v1604_v41, %v1007_v8  ;;  %1865 = vmatmul.mubr.msk.f32.vlgmr.msra.gmra.mxu0 %vm1037_vm2, %v1027_v49 }
 0x21b   :  { %v1840_v11 = vpop.f32.mrf.mxu1  ;;  %1875 = vmatpush3.msk.msra.mxu0 %vm1044_vm1, %v1632_v45 }
 0x21c   :  { %v1028_v13 = vmax.f32 %v1008_v10, 0.0  ;;  %1876 = vmatprep.subr.mxu0 %v1631_v9 }
 0x21d   :  { %v1010_v15 = vpop.f32.mrf.mxu1  ;;  %1877 = vmatpush3.msra.mxu0 %v1631_v9 }
 0x21e   :  { %v1011_v16 = vadd.f32 %v1604_v41, %v1010_v15  ;;  %1871 = vmatprep.mubr.msk.f32.mxu1 %vm1037_vm2, %v1028_v13 }
 0x21f   :  { %v1841_v3 = vpop.f32.mrf.mxu1 }
 0x220   :  { %v1029_v12 = vmax.f32 %v1011_v16, 0.0 }
 0x221   :  { %v1015_v17 = vpop.f32.mrf.mxu1 }
 0x222   :  { %v1016_v18 = vadd.f32 %v1604_v41, %v1015_v17  ;;  %1872 = vmatmul.mubr.msk.f32.vlgmr.msra.gmra.mxu1 %vm1037_vm2, %v1029_v12 }
 0x223   :  { %v1844_v19 = vpop.f32.mrf.mxu1 }
 0x224   :  { %v1030_v20 = vmax.f32 %v1016_v18, 0.0 }
 0x225   :  { %v1018_v21 = vpop.f32.mrf.mxu1 }
 0x226   :  { %v1019_v22 = vadd.f32 %v1604_v41, %v1018_v21  ;;  %1878 = vmatprep.mubr.msk.f32.mxu0 %vm1037_vm2, %v1030_v20 }
 0x227   :  { %v1845_v51 = vpop.f32.mrf.mxu1 }
 0x228   :  { %v1031_v52 = vmax.f32 %v1019_v22, 0.0 }
 0x22a   :  { %1879 = vmatmul.mubr.msk.f32.vlgmr.msra.gmra.mxu0 %vm1037_vm2, %v1031_v52 }
 0x2ca   :  { %v1859_v25 = vpop.f32.mrf.mxu1 }
 0x2cc   :  { %v1198_v57 = vpop.f32.mrf.mxu1 }
 0x2d2   :  { %v1852_v23 = vpop.f32.mrf.mxu0 }
 0x2d3   :  { %v1204_v28 = vadd.f32 %v1859_v25, %v1852_v23 }
 0x2d4   :  { %v1114_v54 = vpop.f32.mrf.mxu0 }
 0x2d5   :  { %v1199_v30 = vadd.f32 %v1198_v57, %v1114_v54 }
 0x2da   :  { %v1866_v26 = vpop.f32.mrf.mxu0 }
 0x2db   :  { %v1295_v31 = vadd.f32 %v1866_v26, %v1204_v28 }
 0x2dc   :  { %v1285_v29 = vpop.f32.mrf.mxu0 }
 0x2dd   :  { %v1294_v33 = vadd.f32 %v1285_v29, %v1199_v30 }
 0x2e2   :  { %v1873_v27 = vpop.f32.mrf.mxu1 }
 0x2e3   :  { %v1384_v34 = vadd.f32 %v1873_v27, %v1295_v31 }
 0x2e4   :  { %v1374_v32 = vpop.f32.mrf.mxu1 }
 0x2e5   :  { %v1383_v36 = vadd.f32 %v1374_v32, %v1294_v33 }
 0x2ea   :  { %v1880_v35 = vpop.f32.mrf.mxu0 }
 0x2eb   :  { %v1473_v37 = vadd.f32 %v1880_v35, %v1384_v34 }
 0x2ec   :  { %v1463_v14 = vpop.f32.mrf.mxu0 }
 0x2ed   :  { %v1482_v38 = vadd.f32 %v1636_v56, %v1473_v37  ;;  %v1472_v41 = vadd.f32 %v1463_v14, %v1383_v36 }
 0x2ef   :  { %v1484_v40 = vmax.f32 %v1482_v38, 0.0  ;;  %v1481_v42 = vadd.f32 %v1636_v56, %v1472_v41 }
 0x2f1   :  { %v1493_v44 = vmul.f32 %v1637_v39, %v1484_v40  ;;  %v1483_v55 = vmax.f32 %v1481_v42, 0.0 }
 0x2f3   :  { %v1502_v58 = vadd.f32 %v1638_v43, %v1493_v44  ;;  %v1492_v60 = vmul.f32 %v1637_v39, %v1483_v55 }
 0x2f5   :  { %1994 = vtanh.f32 %v1502_v58  ;;  %v1501_v61 = vadd.f32 %v1638_v43, %v1492_v60 }
 0x2f7   :  { %1996 = vtanh.f32 %v1501_v61 }
 0x302   :  { %v1995_v62 = vpop.eup %1994 }
 0x303   :  { %1506 = vst.msk [vmem:[#allocation8 + $0x8] sm:$0xff] %vm1037_vm2, %v1995_v62 }
 0x304   :  { %v1997_v63 = vpop.eup %1996 }
 0x305   :  { %1505 = vst.msk [vmem:[#allocation8] sm:$0xff] %vm1037_vm2, %v1997_v63 }
 0x306   :  { %2069 = shalt.err (!%p2066_p5)
}
 0x307   :  { %s2094_s8 = smov 128   ;;  %s2095_s23 = smov 8  }
 0x308   :  { %1518 = dma.vmem_to_hbm [thread:$0]  %s1513_s22, 256, %s2313_s9, [#allocation4], %s2094_s8, %s2094_s8, %s2095_s23  }
 0x309   :  { %2082 = dma.done.wait [#allocation4], 256  }
 0x30a   :  { %2083 = vsyncadd [#allocation4], 4294967040 }
 0x30b   :  { %1522 = vsyncpa [#allocation3], 1 }
 0x30c   :  { %1523 = vsyncpa [#allocation6], 1 }
 0x30d   :  { %1524 = vsyncpa [#allocation4], 1 }

</bundles_post_ra>
